<compile_context>
chip_gen: v7x
topology: tpu7x:2x2x1
jax: 0.10.0
libtpu: 0.0.40
codegen_flags: <defaults>
</compile_context>

<pallas_src>
import functools

import jax
import jax.numpy as jnp
from jax.experimental import pallas as pl
from jax.experimental.pallas import tpu as pltpu


def _adaptive_span_kernel(cv_ref, attn_ref, out_ref, *, span_len, max_span,
                          ramp, row_dependent):
    """Multiply one (r_tile, lane_w) tile by its row's soft span mask.

    cv_ref   : SMEM (BH,) f32 -- clamped current_val per (batch, head) row
    attn_ref : VMEM (r_tile, lane_w) -- attention scores (possibly flattened)
    out_ref  : VMEM (r_tile, lane_w) -- masked scores
    """
    bh = pl.program_id(0)
    cv = cv_ref[bh]                                     # scalar read from SMEM

    r_tile, lane_w = attn_ref.shape

    if row_dependent:
        # Flattened layout where 128 % L != 0: the original key index depends
        # on the global flattened position, so build a full-tile column map.
        row = jax.lax.broadcasted_iota(jnp.int32, (r_tile, lane_w), 0)
        lane = jax.lax.broadcasted_iota(jnp.int32, (r_tile, lane_w), 1)
        r0 = pl.program_id(1) * r_tile                  # first global row of tile
        col = ((r0 + row) * lane_w + lane) % span_len
    else:
        # Column index depends only on the lane -> one broadcast row.
        lane = jax.lax.broadcasted_iota(jnp.int32, (1, lane_w), 1)
        col = lane % span_len if lane_w > span_len else lane

    colf = col.astype(jnp.float32)
    # Matches PyTorch AdaptiveMask exactly (requires L <= max_span):
    #   narrowed template[j] = j - L + 1
    #   mask = clamp((template + cv*max_span)/ramp + 1, 0, 1)
    template = colf - jnp.float32(span_len) + 1.0
    mask = (template + cv * jnp.float32(max_span)) / jnp.float32(ramp) + 1.0
    mask = jnp.clip(mask, 0.0, 1.0)

    out_ref[...] = (attn_ref[...] * mask).astype(out_ref.dtype)


def _pick_target_block_bytes():
    """Default per-step tile budget, tuned per chip generation (best effort)."""
    try:
        info = pltpu.get_tpu_info()
        vmem = int(getattr(info, "vmem_capacity_bytes", 0))
    except Exception:
        vmem = 0
    if vmem and vmem <= (64 << 20):
        # v7x-class: 64 MiB VMEM/TC but ~3.2 TB/s HBM -> bigger tiles to
        # amortize the ~0.35 us per-step pipeline overhead.
        return 5 << 20
    # v5e / v6e: 2-3 MiB tiles are the measured sweet spot and keep the
    # double-buffered in+out working set under the 16 MiB scoped default.
    return 3 << 20


def adaptive_span_forward(attn, current_val, *, n_head, max_span, ramp,
                          adapt_span_layer=False, target_block_bytes=None,
                          vmem_limit_bytes=None):
    """Forward pass of AdaptiveSpan.forward().

    attn:        (batch * n_head, M, L)  (or (B, M, L) if adapt_span_layer)
    current_val: (n_head, 1, 1) learned span parameter, or (1,) if per-layer
    returns:     same shape / dtype as attn
    """
    BH, M, L = attn.shape
    # Reference narrows linspace(1-max_span, 0, max_span) to its last L
    # entries; the in-kernel formula (j - L + 1) matches when L <= max_span.
    assert L <= max_span, "span axis length must not exceed max_span"
    assert M * L < (1 << 24), "flattened plane too large for exact f32 indices"

    # clamp_param(): clamp the learned parameter into [0, 1]
    cv = jnp.clip(jnp.asarray(current_val, jnp.float32).reshape(-1), 0.0, 1.0)
    if adapt_span_layer:
        assert cv.shape[0] == 1
        cv_bh = jnp.broadcast_to(cv, (BH,))
    else:
        assert BH % n_head == 0 and cv.shape[0] == n_head
        B = BH // n_head
        cv_bh = jnp.tile(cv, B)          # cv_bh[b*n_head + h] == cv[h]

    # ---- layout: present a lane-dense (multiple-of-128) last dim if possible
    if L % 128 == 0:
        lane_w, R, row_dep = L, M, False              # already lane-dense
    elif (M * L) % 128 == 0:
        lane_w, R = 128, (M * L) // 128               # contiguous flatten
        row_dep = (128 % L != 0)                      # mask row-dependent?
    else:
        lane_w, R, row_dep = L, M, False              # fallback: partial lanes
    x = attn.reshape(BH, R, lane_w)

    # ---- row tiling: biggest tile under the budget, prefer a divisor of R
    if target_block_bytes is None:
        target_block_bytes = _pick_target_block_bytes()
    itemsize = jnp.dtype(attn.dtype).itemsize
    row_bytes = lane_w * itemsize
    cap_rows = max(8, int(target_block_bytes) // row_bytes)
    if R <= cap_rows:
        r_tile = R
    else:
        r_tile = (cap_rows // 8) * 8
        for cand in range(r_tile, 7, -8):
            if R % cand == 0:
                r_tile = cand
                break
    grid_r = pl.cdiv(R, r_tile)

    # in + out, each double-buffered by the pipeline
    needed_vmem = 4 * r_tile * lane_w * itemsize
    if vmem_limit_bytes is None and needed_vmem > (12 << 20):
        vmem_limit_bytes = min(2 * needed_vmem, 48 << 20)
    cp_kwargs = dict(dimension_semantics=("parallel", "parallel"))
    if vmem_limit_bytes is not None:
        cp_kwargs["vmem_limit_bytes"] = int(vmem_limit_bytes)

    kernel = functools.partial(_adaptive_span_kernel, span_len=L,
                               max_span=max_span, ramp=ramp,
                               row_dependent=row_dep)

    total = BH * R * lane_w
    out = pl.pallas_call(
        kernel,
        out_shape=jax.ShapeDtypeStruct((BH, R, lane_w), attn.dtype),
        grid_spec=pltpu.PrefetchScalarGridSpec(
            num_scalar_prefetch=1,                    # cv_bh lands in SMEM
            grid=(BH, grid_r),
            in_specs=[pl.BlockSpec((None, r_tile, lane_w),
                                   lambda bh, r, cv_ref: (bh, r, 0))],
            out_specs=pl.BlockSpec((None, r_tile, lane_w),
                                   lambda bh, r, cv_ref: (bh, r, 0)),
        ),
        compiler_params=pltpu.CompilerParams(**cp_kwargs),
        cost_estimate=pl.CostEstimate(flops=2 * total, transcendentals=0,
                                      bytes_accessed=2 * total * itemsize),
    )(cv_bh, x)

    return out.reshape(BH, M, L)


def adaptive_span_reference(attn, current_val, *, n_head, max_span, ramp,
                            adapt_span_layer=False):
    """Pure-JAX reference mirroring the PyTorch module exactly."""
    BH, M, L = attn.shape
    cv = jnp.clip(jnp.asarray(current_val, jnp.float32), 0.0, 1.0)
    template = jnp.linspace(1.0 - max_span, 0.0, max_span)          # (max_span,)
    if adapt_span_layer:
        mask = template + cv.reshape(()) * max_span
        mask = jnp.clip(mask / ramp + 1.0, 0.0, 1.0)
        if L < max_span:
            mask = mask[max_span - L:]
        return (attn * mask).astype(attn.dtype)
    B = BH // n_head
    mask = template + cv.reshape(n_head, 1, 1) * max_span            # (h,1,max_span)
    mask = jnp.clip(mask / ramp + 1.0, 0.0, 1.0)
    if L < max_span:
        mask = mask[..., max_span - L:]
    x = attn.reshape(B, n_head, M, L) * mask
    return x.reshape(BH, M, L).astype(attn.dtype)


def _run_case(key, *, batch, n_head, M, L, max_span, ramp, init_val,
              adapt_span_layer=False):
    k_attn, k_cv = jax.random.split(key)
    BH = batch * n_head
    attn = jax.random.normal(k_attn, (BH, M, L), dtype=jnp.float32)
    shape = (1,) if adapt_span_layer else (n_head, 1, 1)
    current_val = init_val + 0.2 * jax.random.uniform(k_cv, shape,
                                                      dtype=jnp.float32)
    # Reference computed BEFORE the kernel (immune to any buffer reuse).
    ref = adaptive_span_reference(attn, current_val, n_head=n_head,
                                  max_span=max_span, ramp=ramp,
                                  adapt_span_layer=adapt_span_layer)
    out = adaptive_span_forward(attn, current_val, n_head=n_head,
                                max_span=max_span, ramp=ramp,
                                adapt_span_layer=adapt_span_layer)
    out = jax.block_until_ready(out)
    assert out.shape == attn.shape and out.dtype == attn.dtype
    err = float(jnp.max(jnp.abs(out - ref)))
    assert jnp.allclose(out, ref, atol=1e-5, rtol=1e-5), f"mismatch, max err={err}"


if __name__ == "__main__":
    key = jax.random.PRNGKey(0)
    keys = jax.random.split(key, 5)

    # Module defaults: attn_span=16, ramp=4, init=0.3, per-head mask.
    _run_case(keys[0], batch=2, n_head=4, M=8, L=16, max_span=16, ramp=4,
              init_val=0.3)
    # L < max_span (exercises template narrowing), broadcast-row lane-dense path.
    _run_case(keys[1], batch=2, n_head=4, M=8, L=16, max_span=32, ramp=4,
              init_val=0.3)
    # L already a multiple of 128 (no flattening needed).
    _run_case(keys[2], batch=2, n_head=4, M=16, L=128, max_span=128, ramp=8,
              init_val=0.3)
    # Awkward L: generalized lane-dense flatten with row-dependent mask.
    _run_case(keys[3], batch=2, n_head=4, M=8, L=48, max_span=64, ramp=8,
              init_val=0.3)
    # adapt_span_layer=True: one shared mask for the whole layer.
    _run_case(keys[4], batch=3, n_head=2, M=8, L=16, max_span=16, ramp=4,
              init_val=0.3, adapt_span_layer=True)

    print("KERNEL_OK")
</pallas_src>

<mosaic_0001>
module attributes {stable_mosaic.version = 11 : i64} {
  func.func @_adaptive_span_kernel(%arg0: i32, %arg1: i32, %arg2: memref<8xf32, #tpu.memory_space<smem>>, %arg3: memref<1x1x128xf32, #tpu.memory_space<vmem>>, %arg4: memref<1x1x128xf32, #tpu.memory_space<vmem>>) attributes {dimension_semantics = [#tpu.dimension_semantics<parallel>, #tpu.dimension_semantics<parallel>], iteration_bounds = array<i64: 8, 1>, scalar_prefetch = 1 : i64, scratch_operands = 0 : i64, tpu.core_type = #tpu.core_type<tc>, window_params = [{transform_indices = @transform_0, window_bounds = array<i64: 1, 1, 128>}, {transform_indices = @transform_1, window_bounds = array<i64: 1, 1, 128>}]} {
    %0 = arith.index_cast %arg0 : i32 to index
    %1 = memref.load %arg2[%0] : memref<8xf32, #tpu.memory_space<smem>>
    %2 = tpu.iota {dimensions = array<i32: 1>} : vector<1x128xi32>
    %c16_i32 = arith.constant 16 : i32
    %c0_i32 = arith.constant 0 : i32
    %3 = arith.cmpi eq, %c16_i32, %c0_i32 : i32
    %c1_i32 = arith.constant 1 : i32
    %4 = arith.select %3, %c1_i32, %c16_i32 : i32
    %5 = vector.broadcast %4 : i32 to vector<1x128xi32>
    %6 = arith.remsi %2, %5 : vector<1x128xi32>
    %c0_i32_0 = arith.constant 0 : i32
    %7 = vector.broadcast %c0_i32_0 : i32 to vector<1x128xi32>
    %8 = arith.cmpi ne, %6, %7 : vector<1x128xi32>
    %c0_i32_1 = arith.constant 0 : i32
    %9 = vector.broadcast %c0_i32_1 : i32 to vector<1x128xi32>
    %10 = arith.cmpi slt, %6, %9 : vector<1x128xi32>
    %c0_i32_2 = arith.constant 0 : i32
    %11 = arith.cmpi slt, %4, %c0_i32_2 : i32
    %12 = vector.broadcast %11 : i1 to vector<1x128xi1>
    %13 = vector.broadcast %12 : vector<1x128xi1> to vector<1x128xi1>
    %14 = arith.xori %10, %13 : vector<1x128xi1>
    %15 = arith.andi %14, %8 : vector<1x128xi1>
    %16 = vector.broadcast %4 : i32 to vector<1x128xi32>
    %17 = arith.addi %6, %16 : vector<1x128xi32>
    %18 = arith.select %15, %17, %6 : vector<1x128xi1>, vector<1x128xi32>
    %19 = arith.sitofp %18 : vector<1x128xi32> to vector<1x128xf32>
    %cst = arith.constant 1.600000e+01 : f32
    %20 = vector.broadcast %cst : f32 to vector<1x128xf32>
    %21 = arith.subf %19, %20 : vector<1x128xf32>
    %cst_3 = arith.constant 1.000000e+00 : f32
    %22 = vector.broadcast %cst_3 : f32 to vector<1x128xf32>
    %23 = arith.addf %21, %22 : vector<1x128xf32>
    %cst_4 = arith.constant 1.600000e+01 : f32
    %24 = arith.mulf %1, %cst_4 : f32
    %25 = vector.broadcast %24 : f32 to vector<1x128xf32>
    %26 = arith.addf %23, %25 : vector<1x128xf32>
    %cst_5 = arith.constant 4.000000e+00 : f32
    %27 = vector.broadcast %cst_5 : f32 to vector<1x128xf32>
    %28 = arith.divf %26, %27 : vector<1x128xf32>
    %cst_6 = arith.constant 1.000000e+00 : f32
    %29 = vector.broadcast %cst_6 : f32 to vector<1x128xf32>
    %30 = arith.addf %28, %29 : vector<1x128xf32>
    %cst_7 = arith.constant 0.000000e+00 : f32
    %cst_8 = arith.constant 1.000000e+00 : f32
    %31 = vector.broadcast %cst_7 : f32 to vector<1x128xf32>
    %32 = arith.maximumf %31, %30 : vector<1x128xf32>
    %33 = vector.broadcast %cst_8 : f32 to vector<1x128xf32>
    %34 = arith.minimumf %33, %32 : vector<1x128xf32>
    %c0 = arith.constant 0 : index
    %c0_9 = arith.constant 0 : index
    %c0_10 = arith.constant 0 : index
    %35 = vector.load %arg3[%c0, %c0_9, %c0_10] : memref<1x1x128xf32, #tpu.memory_space<vmem>>, vector<1x1x128xf32>
    %36 = vector.shape_cast %35 : vector<1x1x128xf32> to vector<1x128xf32>
    %37 = arith.mulf %36, %34 : vector<1x128xf32>
    %c0_11 = arith.constant 0 : index
    %c0_12 = arith.constant 0 : index
    %c0_13 = arith.constant 0 : index
    %38 = vector.load %arg4[%c0_11, %c0_12, %c0_13] : memref<1x1x128xf32, #tpu.memory_space<vmem>>, vector<1x1x128xf32>
    %39 = vector.shape_cast %38 : vector<1x1x128xf32> to vector<1x128xf32>
    %40 = vector.shape_cast %37 : vector<1x128xf32> to vector<1x1x128xf32>
    tpu.vector_store %arg4[%c0_11, %c0_12, %c0_13], %40 {strides = array<i32>} : memref<1x1x128xf32, #tpu.memory_space<vmem>>, vector<1x1x128xf32>,
    return
  }
  func.func @transform_0(%arg0: i32, %arg1: i32, %arg2: memref<8xf32, #tpu.memory_space<smem>>) -> (i32, i32, i32) {
    %c0_i32 = arith.constant 0 : i32
    %c0_i32_0 = arith.constant 0 : i32
    return %arg0, %arg1, %c0_i32 : i32, i32, i32
  }
  func.func @transform_1(%arg0: i32, %arg1: i32, %arg2: memref<8xf32, #tpu.memory_space<smem>>) -> (i32, i32, i32) {
    %c0_i32 = arith.constant 0 : i32
    %c0_i32_0 = arith.constant 0 : i32
    return %arg0, %arg1, %c0_i32 : i32, i32, i32
  }
}

</mosaic_0001>

<bundles_post_ra>
// kernel: tpu_custom_call.1
= control target key start
LH: loop header
LB: loop body
LE: loop exit
PB: predicated region body
PF: predicated region fallthrough
CT: control target
= control target key end

     0   :  { %s667_s0 = inlined_call_operand.hbm [shape: f32[8], index: 0, kind: input, shape index: {}]   ;;  %s668_s1 = inlined_call_operand.hbm [shape: f32[8,1,128], index: 1, kind: input, shape index: {}]   ;;  %s669_s2 = inlined_call_operand.hbm [shape: f32[8,1,128], index: 2, kind: output, shape index: {}]  }
   0x1   :  { %s339_s11 = scalar_lea.hbm %s667_s0, 16 }
   0x2   :  { %p340_p0 = scmp.ne.s32.totalorder %s667_s0, %s339_s11  ;;  %p343_p1 = scmp.lt.u32.totalorder %s339_s11, %s667_s0 }
   0x4   :  { %p345_p2 = pnand %p343_p1, %p340_p0 }
   0x6   :  { %348 = shalt.err (!%p345_p2)  }
   0x7   :  { %s465_s16 = smov [#allocation3]  }
   0x8   :  { %8 = dma.hbm_to_smem %s667_s0, 16, %s465_s16, [#allocation2] }
   0x9   :  { %431 = dma.done.wait [#allocation2], 16 }
   0xa   :  { %432 = vsyncadd [#allocation2], 4294967280 }
   0xb   :  { %10 = sfence }
   0xc   :  { %11 = vsyncpa [#allocation5], 0 }
   0xd   :  { %13 = vsyncpa [#allocation5 + $0x1], 0 }
   0xe   :  { %14 = vsyncpa [#allocation6], 0 }
   0xf   :  { %16 = vsyncpa [#allocation6 + $0x1], 0  ;;  %s495_s19 = smov 0   ;;  %s497_s20 = smov 0  }
  0x10   :  { %s499_s21 = smov 0   ;;  %s501_s22 = smov 0  }
  0x11   :  { %s503_s23 = smov 0   ;;  %s505_s24 = smov 0  }
  0x12 LB: > { %s266_s0 = sadd.s32 4294967295, %s463_s24   ;;  %s267_s25 = sadd.s32 4294967294, %s463_s24   ;;  %s463_s24 = sphi %s505_s24, %s22_s24   ;;  %s459_s23 = sphi %s503_s23, %s684_s23   ;;  %s455_s22 = sphi %s501_s22, %s683_s22   ;;  %s451_s21 = sphi %s499_s21, %s682_s21   ;;  %s447_s20 = sphi %s497_s20, %s681_s20   ;;  %s443_s19 = sphi %s495_s19, %s680_s19  }
  0x13   : > { %s34_s26 = sadd.s32 1, %s459_s23  ;;  %s43_s27 = sadd.s32 1, %s451_s21 }
  0x14   : > { %p36_p3 = scmp.ge.s32.totalorder %s34_s26, 8  ;;  %p50_p4 = scmp.ne.s32.totalorder %s451_s21, %s447_s20 }
  0x15   : > { %p51_p5 = scmp.eq.s32.totalorder %s463_s24, 0  ;;  %p56_p6 = scmp.ne.s32.totalorder %s447_s20, %s443_s19 }
  0x16   : > { %s686_s26 = smov (%p36_p3, %s34_s26), 0  ;;  %p57_p8 = scmp.eq.s32.totalorder %s266_s0, 0 }
  0x17   : > { %p536_p7 = por %p51_p5, %p50_p4  ;;  %s38_s29 = ssub.s32 %s459_s23, %s686_s26 }
  0x18   : > { %p82_p9 = scmp.eq.s32.totalorder %s266_s0, 7  ;;  %p41_p10 = scmp.eq.s32.totalorder %s38_s29, 0 }
  0x19   : > { %p542_p11 = por %p57_p8, %p56_p6  ;;  %p88_p13 = scmp.eq.s32.totalorder %s267_s25, 7 }
  0x1a   : > { %p546_p12 = por %p82_p9, %p50_p4  ;;  %p288_p1 = scmp.lt.s32.totalorder %s463_s24, 8 }
  0x1b   : > { %s551_s4 = scalar_select %p41_p10, %s451_s21, %s43_s27  }
  0x1c   : > { %s673_s3 = scalar_select %p546_p12, 1, 0 }
  0x1d   : > { %p553_p0 = por %p88_p13, %p56_p6  ;;  %s108_s6 = sand.u32 1, %s451_s21  }
  0x1e   : > { %s270_s7 = sshll.u32 %s459_s23, 4  ;;  %s111_s8 = scalar_lea.vmem [#allocation4], %s108_s6 }
  0x1f   : > { %s674_s5 = scalar_select %p553_p0, 1, 0 }
  0x20   : > { %s119_s9 = sshll.u32 %s111_s8, 4  ;;  %s563_s12 = scalar_lea.hbm %s668_s1, %s270_s7  ;;  %s565_s9 = int_to_ptr.vmem [resolvable:$true] %s119_s9 }
  0x21   : > { %p569_p2 = pnand %p288_p1, %p536_p7  ;;  %s109_s14 = scalar_lea.sflag [#allocation5], %s108_s6 }
  0x22   : > { %s349_s15 = scalar_lea.hbm %s563_s12, 16  ;;  %s354_s18 = scalar_lea.hbm %s668_s1, 128 }
  0x23   : > { %p350_p5 = scmp.ne.s32.totalorder %s563_s12, %s349_s15  ;;  %p351_p6 = pneg %p569_p2 }
  0x24   : > { %p355_p7 = scmp.lt.u32.totalorder %s563_s12, %s668_s1  ;;  %p356_p10 = scmp.lt.u32.totalorder %s354_s18, %s349_s15 }
  0x25   : > { %p352_p8 = pnand %p351_p6, %p350_p5  ;;  %p358_p1 = scmp.lt.u32.totalorder %s349_s15, %s563_s12 }
  0x26   : > { %p357_p13 = por %p356_p10, %p355_p7 }
  0x27   : > { %p353_p9 = pneg %p352_p8 }
  0x28   : > { %p359_p3 = por %p358_p1, %p357_p13 }
  0x2a   : > { %p360_p4 = pnand %p359_p3, %p353_p9 }
  0x2c   : > { %363 = shalt.err (!%p360_p4)
}
  0x2d   : > { %s364_s27 = scalar_lea.vmem %s565_s9, 16  ;;  %s466_s28 = smov [#allocation4]  }
  0x2e   : > { %p365_p5 = scmp.ne.s32.totalorder %s565_s9, %s364_s27  ;;  %s369_s29 = sshll.u32 %s466_s28, 4  ;;  %s370_s29 = int_to_ptr.vmem [resolvable:$false] %s369_s29 }
  0x2f   : > { %s371_s6 = scalar_lea.vmem %s370_s29, 32  ;;  %p372_p12 = scmp.lt.s32.totalorder %s565_s9, %s370_s29 }
  0x30   : > { %p367_p8 = pnand %p365_p5, %p351_p6  ;;  %p373_p7 = scmp.lt.s32.totalorder %s371_s6, %s364_s27 }
  0x32   : > { %p368_p0 = pneg %p367_p8  ;;  %p374_p10 = por %p373_p7, %p372_p12 }
  0x34   : > { %p375_p13 = pnand %p374_p10, %p368_p0 }
  0x36   : > { %378 = shalt.err (!%p375_p13)
}
  0x37   : > { %283 = dma.hbm_to_vmem [thread:$0]  (!%p569_p2), %s563_s12, 16, %s565_s9, %s109_s14  }
  0x38   : > { %p676_p3 = scmp.lt.s32.totalorder %s463_s24, 9  ;;  %p677_p4 = scmp.ge.s32.totalorder %s463_s24, 1 }
  0x3a   : > { %p125_p6 = pnand %p677_p4, %p676_p3 }
  0x3b   : > { %s605_s7 = sand.u32 (!%p125_p6), 1, %s447_s20  }
  0x3c   : > { %128 = sbr.rel (%p125_p6) target bundleno = 106 (0x6a), region = 24  ;;  %s131_s8 = scalar_lea.sflag (!%p125_p6), [#allocation5], %s605_s7 }
  0x3d   : > { %s133_s10 = scalar_lea.vmem (!%p125_p6), [#allocation4], %s605_s7 }
  0x43   : > { %434 = dma.done.wait (%p542_p11), %s131_s8, 16  }
  0x44   : > { %436 = vsyncadd (%p542_p11), %s131_s8, 4294967280  ;;  %v151_v0 = vlaneseq  ;;  %s150_s9 = sld [smem:[#allocation3 + %s455_s22]]  ;;  %v176_v11 = vld [vmem:[%s133_s10] sm:$0x1]  ;;  %s149_s30 = scalar_lea.vmem [#allocation7], %s605_s7 }
  0x45   : > { %s193_s12 = sshll.u32 %s149_s30, 4  ;;  %s273_s13 = sshll.u32 %s455_s22, 4  ;;  %s616_s12 = int_to_ptr.vmem [resolvable:$true] %s193_s12 }
  0x46   : > { %v152_v1 = vand.u32 127, %v151_v0  ;;  %s621_s16 = scalar_lea.hbm %s669_s2, %s273_s13  ;;  %s180_s17 = scalar_lea.sflag [#allocation6], %s605_s7 }
  0x47   : > { %s379_s18 = scalar_lea.vmem %s616_s12, 16  ;;  %p678_p12 = scmp.ne.s32.totalorder %s673_s3, 0 }
  0x48   : > { %v157_v2 = vand.u32 15, %v152_v1  ;;  %p380_p11 = scmp.ne.s32.totalorder %s616_s12, %s379_s18  ;;  %s467_s22 = smov [#allocation7]  }
  0x49   : > { %s383_s0 = sshll.u32 %s467_s22, 4  ;;  %s384_s0 = int_to_ptr.vmem [resolvable:$false] %s383_s0 }
  0x4a   : > { %v165_v3 = vcvt.s32.f32 %v157_v2  ;;  %s168_s11 = smul.f32 16.0, %s150_s9  ;;  %p381_p0 = pnand %p380_p11, %p678_p12 }
  0x4b   : > { %s385_s25 = scalar_lea.vmem %s384_s0, 32  ;;  %p386_p9 = scmp.lt.s32.totalorder %s616_s12, %s384_s0 }
  0x4c   : > { %v272_v4 = vadd.f32 -16.0, %v165_v3  ;;  %v169_v5 = vstv %s168_s11  ;;  %p382_p2 = pneg %p381_p0  ;;  %p387_p1 = scmp.lt.s32.totalorder %s385_s25, %s379_s18 }
  0x4e   : > { %v167_v6 = vadd.f32 1.0, %v272_v4  ;;  %p388_p5 = por %p387_p1, %p386_p9 }
  0x50   : > { %v170_v7 = vadd.f32 %v169_v5, %v167_v6  ;;  %p389_p8 = pnand %p388_p5, %p382_p2 }
  0x52   : > { %v172_v8 = vmul.f32 0.25, %v170_v7 }
  0x54   : > { %v173_v9 = vadd.f32 1.0, %v172_v8 }
  0x56   : > { %v174_v10 = vmax.f32 %v173_v9, 0.0 }
  0x58   : > { %v175_v12 = vmin.f32 %v174_v10, 1.0 }
  0x5a   : > { %v177_v13 = vmul.f32 %v176_v11, %v175_v12 }
  0x5c   : > { %178 = vst [vmem:[%s149_s30] sm:$0x1] %v177_v13 }
  0x5d   : > { %392 = shalt.err (!%p389_p8)
}
  0x5e   : > { %s393_s27 = scalar_lea.hbm %s621_s16, 16  ;;  %s397_s6 = scalar_lea.hbm %s669_s2, 128 }
  0x5f   : > { %p394_p7 = scmp.ne.s32.totalorder %s621_s16, %s393_s27  ;;  %p398_p3 = scmp.lt.u32.totalorder %s621_s16, %s669_s2 }
  0x60   : > { %p399_p4 = scmp.lt.u32.totalorder %s397_s6, %s393_s27  ;;  %p401_p11 = scmp.lt.u32.totalorder %s393_s27, %s621_s16 }
  0x61   : > { %p395_p10 = pnand %p394_p7, %p678_p12 }
  0x62   : > { %p400_p6 = por %p399_p4, %p398_p3 }
  0x63   : > { %p396_p13 = pneg %p395_p10 }
  0x64   : > { %p402_p0 = por %p401_p11, %p400_p6 }
  0x66   : > { %p403_p2 = pnand %p402_p0, %p396_p13 }
  0x68   : > { %406 = shalt.err (!%p403_p2)
}
  0x69   : > { %278 = dma.vmem_to_hbm [thread:$0]  (%p678_p12), %s616_s12, 16, %s621_s16, %s180_s17  }
  0x6a PF: > { %p289_p9 = scmp.ge.s32.totalorder %s463_s24, 2  ;;  %s205_s10 = sand.u32 1, %s443_s19  }
  0x6b   : > { %p679_p1 = scmp.ne.s32.totalorder %s674_s5, 0  ;;  %s206_s9 = scalar_lea.sflag [#allocation6], %s205_s10 }
  0x6d   : > { %p285_p5 = pnand %p289_p9, %p679_p1 }
  0x6f   : > { %438 = dma.done.wait (!%p285_p5), %s206_s9, 16  }
  0x70   : > { %440 = vsyncadd (!%p285_p5), %s206_s9, 4294967280  ;;  %s22_s24 = sadd.s32 1, %s463_s24   ;;  %s680_s19 = smov %s447_s20 }
  0x71   : > { %p19_p8 = scmp.ge.s32.totalorder %s22_s24, 10   ;;  %s681_s20 = smov %s451_s21 }
  0x72   : > { %s682_s21 = smov %s551_s4  ;;  %s683_s22 = smov %s459_s23 }
  0x73   : > { %s684_s23 = smov %s686_s26  ;;  %21 = sbr.rel (!%p19_p8) target bundleno = 18 (0x12), region = 69 }
  0x7a   :  { %210 = vsyncpa [#allocation5], 1 }
  0x7b   :  { %212 = vsyncpa [#allocation5 + $0x1], 1 }
  0x7c   :  { %213 = vsyncpa [#allocation6], 1 }
  0x7d   :  { %215 = vsyncpa [#allocation6 + $0x1], 1 }

</bundles_post_ra>
